<compile_context>
chip_gen: v5e
topology: v5e:2x2
jax: 0.10.0
libtpu: 0.0.40
codegen_flags: <defaults>
</compile_context>

<pallas_src>
import math
import jax
import jax.numpy as jnp
from jax import lax
from jax.experimental import pallas as pl
from jax.experimental.pallas import tpu as pltpu

# ---- configuration (small, consistent with the module) ----
B = 2              # batch
IN_CH = 4          # in_channels
N = 16             # nodes per graph
OUT_CH = 32        # out_channels
HEADS = 4
HEAD_DIM = OUT_CH // HEADS     # per-head dim of TransformerConv
M = B * N                      # total nodes after flattening
FFN_HID = 2 * OUT_CH           # feed-forward hidden width (64)
LANES = 128                    # lane-dense output width (wrapper slices OUT_CH)


def _graph_transformer_kernel(x_all_ref, x_tgt_ref, adj_ref, bias_ref,
                              wsrc_ref, bsrc_ref, wtgt_ref, btgt_ref,
                              w2_ref, b2_ref, out_ref):
    # Source-node projection for ALL nodes: columns [ k | v'_0 | v'_1 | v'_2 | v'_3 ]
    # where v'_h = Wv_h @ W1_h (first FFN linear folded offline).
    proj_src = jnp.dot(x_all_ref[...], wsrc_ref[...],
                       preferred_element_type=jnp.float32) + bsrc_ref[...]
    # Target-node projection for this tile: columns [ q (1/sqrt(d) folded) | skip' ]
    # where skip' = Ws @ W1 with bias (bs @ W1 + b1) folded in.
    proj_tgt = jnp.dot(x_tgt_ref[...], wtgt_ref[...],
                       preferred_element_type=jnp.float32) + btgt_ref[...]

    adj = adj_ref[...]      # [tile, M] 0/1 incoming-edge mask (isolated-node guard)
    bias = bias_ref[...]    # [tile, M] additive softmax mask (0 / -1e30), precomputed

    k_all = proj_src[:, :OUT_CH]                       # [M, OUT_CH]
    q = proj_tgt[:, :OUT_CH]                           # [tile, OUT_CH] (pre-scaled)
    h1 = proj_tgt[:, OUT_CH:OUT_CH + FFN_HID]          # skip' -> pre-ReLU FFN hidden acc

    # q @ k^T without materializing a transpose (contract feature dim of both operands).
    dn_q_kT = (((1,), (1,)), ((), ()))
    for h in range(HEADS):            # static unroll; per-head results stay in registers
        o = h * HEAD_DIM
        qh = q[:, o:o + HEAD_DIM]                                        # [tile, d]
        kh = k_all[:, o:o + HEAD_DIM]                                    # [M, d]
        vh = proj_src[:, OUT_CH + h * FFN_HID:OUT_CH + (h + 1) * FFN_HID]  # [M, FFN_HID]
        logits = lax.dot_general(qh, kh, dn_q_kT,
                                 preferred_element_type=jnp.float32) + bias  # [tile, M]
        p = jnp.exp(logits - jnp.max(logits, axis=-1, keepdims=True)) * adj
        # keep the `* adj` guard: isolated nodes must aggregate to exactly zero
        denom = jnp.maximum(jnp.sum(p, axis=-1, keepdims=True), jnp.float32(1e-30))
        ov = jnp.dot(p, vh, preferred_element_type=jnp.float32)          # [tile, FFN_HID]
        h1 = h1 + ov * pl.reciprocal(denom, approx=True)   # deferred softmax normalization

    h1 = jnp.maximum(h1, 0.0)                                            # FFN ReLU
    h2 = jnp.dot(h1, w2_ref[...], preferred_element_type=jnp.float32) + b2_ref[...]
    out_ref[...] = jnp.maximum(h2, 0.0)        # [tile, 128] lane-dense unmasked store


def _make_params(key):
    """Deterministic parameter init (shapes match the PyTorch module)."""
    def lin(k, fan_in, fan_out):
        kw, kb = jax.random.split(k)
        bound = 1.0 / math.sqrt(fan_in)
        w = jax.random.uniform(kw, (fan_in, fan_out), jnp.float32, -bound, bound)
        b = jax.random.uniform(kb, (1, fan_out), jnp.float32, -bound, bound)
        return w, b

    keys = jax.random.split(key, 6)
    wq, bq = lin(keys[0], IN_CH, OUT_CH)          # lin_query
    wk, bk = lin(keys[1], IN_CH, OUT_CH)          # lin_key
    wv, bv = lin(keys[2], IN_CH, OUT_CH)          # lin_value
    ws, bs = lin(keys[3], IN_CH, OUT_CH)          # lin_skip (root weight)
    w1, b1 = lin(keys[4], OUT_CH, FFN_HID)        # feed_forward[0]
    w2, b2 = lin(keys[5], FFN_HID, OUT_CH)        # feed_forward[3]
    return (wq, bq, wk, bk, wv, bv, ws, bs, w1, b1, w2, b2)


def pack_params(params):
    """One-time packing: fold W1 into v/skip, fold 1/sqrt(d) into q, pad W2 to 128 lanes."""
    wq, bq, wk, bk, wv, bv, ws, bs, w1, b1, w2, b2 = params
    scale = jnp.float32(1.0 / math.sqrt(HEAD_DIM))

    # Per-head fold of the first FFN linear into the value projection (exact algebra):
    #   alpha_h @ (x Wv_h + bv_h) @ W1_h == alpha_h @ (x (Wv_h W1_h) + bv_h W1_h)
    v_w_cols, v_b_cols = [], []
    for h in range(HEADS):
        o = h * HEAD_DIM
        w1_h = w1[o:o + HEAD_DIM, :]                    # [HEAD_DIM, FFN_HID]
        v_w_cols.append(wv[:, o:o + HEAD_DIM] @ w1_h)   # [IN_CH, FFN_HID]
        v_b_cols.append(bv[:, o:o + HEAD_DIM] @ w1_h)   # [1, FFN_HID]

    # Source-node packed projection:  [ k | v'_0 | v'_1 | v'_2 | v'_3 ]
    w_src = jnp.concatenate([wk] + v_w_cols, axis=1)    # [IN_CH, OUT_CH + HEADS*FFN_HID]
    b_src = jnp.concatenate([bk] + v_b_cols, axis=1)    # [1,      OUT_CH + HEADS*FFN_HID]

    # Target-node packed projection: [ q (1/sqrt(d) folded) | skip' (= Ws W1, bias bs W1 + b1) ]
    w_tgt = jnp.concatenate([wq * scale, ws @ w1], axis=1)        # [IN_CH, OUT_CH + FFN_HID]
    b_tgt = jnp.concatenate([bq * scale, bs @ w1 + b1], axis=1)   # [1,      OUT_CH + FFN_HID]

    # Second FFN linear, output zero-padded to 128 lanes for an unmasked lane-dense store.
    w2p = jnp.zeros((FFN_HID, LANES), jnp.float32).at[:, :OUT_CH].set(w2)
    b2p = jnp.zeros((1, LANES), jnp.float32).at[:, :OUT_CH].set(b2)
    return (w_src, b_src, w_tgt, b_tgt, w2p, b2p)


def build_graph_masks(edge_index, num_nodes=M):
    """Module's edge_index glue + dense masks (precompute ONCE per graph, off the hot path).
       adj[i, j] = 1 iff edge j -> i ; bias = 0 on edges, -1e30 elsewhere."""
    if edge_index.ndim == 4:
        edge_index = jnp.transpose(edge_index, (1, 0, 2, 3)).reshape(2, -1)
    elif edge_index.ndim == 3:
        edge_index = jnp.transpose(edge_index, (1, 0, 2)).reshape(2, -1)
    src = edge_index[0]   # message source j
    dst = edge_index[1]   # message target i
    # TODO(synk): duplicate edges collapse to one mask entry; PyG would softmax each
    # duplicate edge separately (multigraph semantics differ).
    adj = jnp.zeros((num_nodes, num_nodes), jnp.float32).at[dst, src].set(1.0)
    bias = jnp.where(adj > 0, jnp.float32(0.0), jnp.float32(-1e30))
    return adj, bias


def graph_transformer_layer(x, adj, bias, packed_params):
    """x: (B, IN_CH, N, 1) f32; adj/bias: (B*N, B*N) f32 precomputed incoming-edge masks."""
    w_src, b_src, w_tgt, b_tgt, w2p, b2p = packed_params
    Bx, Cx, Nx, _ = x.shape
    m = Bx * Nx

    # --- module's reshape glue (plain JAX; no bias concat needed any more) ---
    x_nodes = jnp.transpose(x[..., 0], (0, 2, 1)).reshape(m, Cx)

    # Grid over target-node tiles: at m=32 this is a single tile; when many graphs are
    # packed into one call (block-diagonal adj, m >= 256) the 128-row tiles shard across
    # v7x's two TensorCores via the "parallel" semantic (harmless on v5e/v6e).
    tile_m = 128 if (m % 128 == 0) else m
    grid = (m // tile_m,)

    out = pl.pallas_call(
        _graph_transformer_kernel,
        out_shape=jax.ShapeDtypeStruct((m, LANES), jnp.float32),
        grid=grid,
        in_specs=[
            pl.BlockSpec((m, Cx), lambda i: (0, 0)),          # x_all  (k / v' sources)
            pl.BlockSpec((tile_m, Cx), lambda i: (i, 0)),     # x_tgt  (q / skip' targets)
            pl.BlockSpec((tile_m, m), lambda i: (i, 0)),      # adj rows for this tile
            pl.BlockSpec((tile_m, m), lambda i: (i, 0)),      # additive mask rows
            pl.BlockSpec(w_src.shape, lambda i: (0, 0)),
            pl.BlockSpec(b_src.shape, lambda i: (0, 0)),
            pl.BlockSpec(w_tgt.shape, lambda i: (0, 0)),
            pl.BlockSpec(b_tgt.shape, lambda i: (0, 0)),
            pl.BlockSpec(w2p.shape, lambda i: (0, 0)),
            pl.BlockSpec(b2p.shape, lambda i: (0, 0)),
        ],
        out_specs=pl.BlockSpec((tile_m, LANES), lambda i: (i, 0)),
        compiler_params=pltpu.CompilerParams(
            dimension_semantics=("parallel",)),
    )(x_nodes, x_nodes, adj, bias, w_src, b_src, w_tgt, b_tgt, w2p, b2p)

    out = out[:, :OUT_CH]                                  # drop lane padding
    return jnp.transpose(out.reshape(Bx, Nx, OUT_CH), (0, 2, 1))[..., None]


if __name__ == "__main__":
    key = jax.random.PRNGKey(0)
    k_x, k_p = jax.random.split(key)

    x = jax.random.normal(k_x, (B, IN_CH, N, 1), dtype=jnp.float32)

    # edge_index with GLOBAL node ids (self-loop + ring within each graph)
    srcs, dsts = [], []
    for b in range(B):
        for n in range(N):
            g = b * N + n
            srcs += [g, b * N + (n + 1) % N]   # self-loop, ring neighbor
            dsts += [g, g]
    edge_index = jnp.array([srcs, dsts], dtype=jnp.int32)   # (2, E)

    params = _make_params(k_p)
    packed = pack_params(params)                  # one-time packing (not per-call)
    adj, bias = build_graph_masks(edge_index)     # one-time dense masks (not per-call)

    layer = jax.jit(graph_transformer_layer)
    out = layer(x, adj, bias, packed)
    jax.block_until_ready(out)
    assert out.shape == (B, OUT_CH, N, 1)
    print("KERNEL_OK")
</pallas_src>

<mosaic_0001>
module attributes {stable_mosaic.version = 11 : i64} {
  func.func @_graph_transformer_kernel(%arg0: i32, %arg1: memref<32x4xf32, #tpu.memory_space<vmem>>, %arg2: memref<32x4xf32, #tpu.memory_space<vmem>>, %arg3: memref<32x32xf32, #tpu.memory_space<vmem>>, %arg4: memref<32x32xf32, #tpu.memory_space<vmem>>, %arg5: memref<4x288xf32, #tpu.memory_space<vmem>>, %arg6: memref<1x288xf32, #tpu.memory_space<vmem>>, %arg7: memref<4x96xf32, #tpu.memory_space<vmem>>, %arg8: memref<1x96xf32, #tpu.memory_space<vmem>>, %arg9: memref<64x128xf32, #tpu.memory_space<vmem>>, %arg10: memref<1x128xf32, #tpu.memory_space<vmem>>, %arg11: memref<32x128xf32, #tpu.memory_space<vmem>>) attributes {dimension_semantics = [#tpu.dimension_semantics<parallel>], iteration_bounds = array<i64: 1>, scalar_prefetch = 0 : i64, scratch_operands = 0 : i64, tpu.core_type = #tpu.core_type<tc>, window_params = [{pipeline_mode = #tpu.pipeline_mode<synchronous>, transform_indices = @transform_0, window_bounds = array<i64: 32, 4>}, {transform_indices = @transform_1, window_bounds = array<i64: 32, 4>}, {transform_indices = @transform_2, window_bounds = array<i64: 32, 32>}, {transform_indices = @transform_3, window_bounds = array<i64: 32, 32>}, {pipeline_mode = #tpu.pipeline_mode<synchronous>, transform_indices = @transform_4, window_bounds = array<i64: 4, 288>}, {pipeline_mode = #tpu.pipeline_mode<synchronous>, transform_indices = @transform_5, window_bounds = array<i64: 1, 288>}, {pipeline_mode = #tpu.pipeline_mode<synchronous>, transform_indices = @transform_6, window_bounds = array<i64: 4, 96>}, {pipeline_mode = #tpu.pipeline_mode<synchronous>, transform_indices = @transform_7, window_bounds = array<i64: 1, 96>}, {pipeline_mode = #tpu.pipeline_mode<synchronous>, transform_indices = @transform_8, window_bounds = array<i64: 64, 128>}, {pipeline_mode = #tpu.pipeline_mode<synchronous>, transform_indices = @transform_9, window_bounds = array<i64: 1, 128>}, {transform_indices = @transform_10, window_bounds = array<i64: 32, 128>}]} {
    %c0 = arith.constant 0 : index
    %c0_0 = arith.constant 0 : index
    %0 = vector.load %arg1[%c0, %c0_0] : memref<32x4xf32, #tpu.memory_space<vmem>>, vector<32x4xf32>
    %c0_1 = arith.constant 0 : index
    %c0_2 = arith.constant 0 : index
    %1 = vector.load %arg5[%c0_1, %c0_2] : memref<4x288xf32, #tpu.memory_space<vmem>>, vector<4x288xf32>
    %cst = arith.constant dense<0.000000e+00> : vector<32x288xf32>
    %2 = tpu.matmul %0, %1, %cst {dimension_numbers = #tpu.dot_dimension_numbers<[1], [0], [0], [1], [0, 0, 1, 1], [], []>} : vector<32x4xf32>, vector<4x288xf32>, vector<32x288xf32> -> vector<32x288xf32>
    %c0_3 = arith.constant 0 : index
    %c0_4 = arith.constant 0 : index
    %3 = vector.load %arg6[%c0_3, %c0_4] : memref<1x288xf32, #tpu.memory_space<vmem>>, vector<1x288xf32>
    %4 = vector.broadcast %3 : vector<1x288xf32> to vector<32x288xf32>
    %5 = arith.addf %2, %4 : vector<32x288xf32>
    %c0_5 = arith.constant 0 : index
    %c0_6 = arith.constant 0 : index
    %6 = vector.load %arg2[%c0_5, %c0_6] : memref<32x4xf32, #tpu.memory_space<vmem>>, vector<32x4xf32>
    %c0_7 = arith.constant 0 : index
    %c0_8 = arith.constant 0 : index
    %7 = vector.load %arg7[%c0_7, %c0_8] : memref<4x96xf32, #tpu.memory_space<vmem>>, vector<4x96xf32>
    %cst_9 = arith.constant dense<0.000000e+00> : vector<32x96xf32>
    %8 = tpu.matmul %6, %7, %cst_9 {dimension_numbers = #tpu.dot_dimension_numbers<[1], [0], [0], [1], [0, 0, 1, 1], [], []>} : vector<32x4xf32>, vector<4x96xf32>, vector<32x96xf32> -> vector<32x96xf32>
    %c0_10 = arith.constant 0 : index
    %c0_11 = arith.constant 0 : index
    %9 = vector.load %arg8[%c0_10, %c0_11] : memref<1x96xf32, #tpu.memory_space<vmem>>, vector<1x96xf32>
    %10 = vector.broadcast %9 : vector<1x96xf32> to vector<32x96xf32>
    %11 = arith.addf %8, %10 : vector<32x96xf32>
    %c0_12 = arith.constant 0 : index
    %c0_13 = arith.constant 0 : index
    %12 = vector.load %arg3[%c0_12, %c0_13] : memref<32x32xf32, #tpu.memory_space<vmem>>, vector<32x32xf32>
    %c0_14 = arith.constant 0 : index
    %c0_15 = arith.constant 0 : index
    %13 = vector.load %arg4[%c0_14, %c0_15] : memref<32x32xf32, #tpu.memory_space<vmem>>, vector<32x32xf32>
    %14 = vector.extract_strided_slice %5 {offsets = [0, 0], sizes = [32, 32], strides = [1, 1]} : vector<32x288xf32> to vector<32x32xf32>
    %15 = vector.extract_strided_slice %11 {offsets = [0, 0], sizes = [32, 32], strides = [1, 1]} : vector<32x96xf32> to vector<32x32xf32>
    %16 = vector.extract_strided_slice %11 {offsets = [0, 32], sizes = [32, 64], strides = [1, 1]} : vector<32x96xf32> to vector<32x64xf32>
    %17 = vector.extract_strided_slice %15 {offsets = [0, 0], sizes = [32, 8], strides = [1, 1]} : vector<32x32xf32> to vector<32x8xf32>
    %18 = vector.extract_strided_slice %14 {offsets = [0, 0], sizes = [32, 8], strides = [1, 1]} : vector<32x32xf32> to vector<32x8xf32>
    %19 = vector.extract_strided_slice %5 {offsets = [0, 32], sizes = [32, 64], strides = [1, 1]} : vector<32x288xf32> to vector<32x64xf32>
    %cst_16 = arith.constant dense<0.000000e+00> : vector<32x32xf32>
    %20 = tpu.matmul %17, %18, %cst_16 {dimension_numbers = #tpu.dot_dimension_numbers<[1], [1], [0], [0], [0, 0, 1, 0], [], []>} : vector<32x8xf32>, vector<32x8xf32>, vector<32x32xf32> -> vector<32x32xf32>
    %21 = arith.addf %20, %13 : vector<32x32xf32>
    %cst_17 = arith.constant dense<0xFF800000> : vector<32xf32>
    %22 = vector.multi_reduction <maximumf>, %21, %cst_17 [1] : vector<32x32xf32> to vector<32xf32>
    %23 = vector.shape_cast %22 : vector<32xf32> to vector<32x1xf32>
    %24 = vector.broadcast %23 : vector<32x1xf32> to vector<32x32xf32>
    %25 = arith.subf %21, %24 : vector<32x32xf32>
    %26 = math.exp %25 : vector<32x32xf32>
    %27 = arith.mulf %26, %12 : vector<32x32xf32>
    %cst_18 = arith.constant dense<0.000000e+00> : vector<32xf32>
    %28 = vector.multi_reduction <add>, %27, %cst_18 [1] : vector<32x32xf32> to vector<32xf32>
    %29 = vector.shape_cast %28 : vector<32xf32> to vector<32x1xf32>
    %cst_19 = arith.constant 1.000000e-30 : f32
    %30 = vector.broadcast %cst_19 : f32 to vector<32x1xf32>
    %31 = arith.maximumf %29, %30 : vector<32x1xf32>
    %cst_20 = arith.constant dense<0.000000e+00> : vector<32x64xf32>
    %32 = tpu.matmul %27, %19, %cst_20 {dimension_numbers = #tpu.dot_dimension_numbers<[1], [0], [0], [1], [0, 0, 1, 1], [], []>} : vector<32x32xf32>, vector<32x64xf32>, vector<32x64xf32> -> vector<32x64xf32>
    %33 = tpu.reciprocal %31 {approx = true} : vector<32x1xf32> -> vector<32x1xf32>
    %34 = vector.broadcast %33 : vector<32x1xf32> to vector<32x64xf32>
    %35 = arith.mulf %32, %34 : vector<32x64xf32>
    %36 = arith.addf %16, %35 : vector<32x64xf32>
    %37 = vector.extract_strided_slice %15 {offsets = [0, 8], sizes = [32, 8], strides = [1, 1]} : vector<32x32xf32> to vector<32x8xf32>
    %38 = vector.extract_strided_slice %14 {offsets = [0, 8], sizes = [32, 8], strides = [1, 1]} : vector<32x32xf32> to vector<32x8xf32>
    %39 = vector.extract_strided_slice %5 {offsets = [0, 96], sizes = [32, 64], strides = [1, 1]} : vector<32x288xf32> to vector<32x64xf32>
    %cst_21 = arith.constant dense<0.000000e+00> : vector<32x32xf32>
    %40 = tpu.matmul %37, %38, %cst_21 {dimension_numbers = #tpu.dot_dimension_numbers<[1], [1], [0], [0], [0, 0, 1, 0], [], []>} : vector<32x8xf32>, vector<32x8xf32>, vector<32x32xf32> -> vector<32x32xf32>
    %41 = arith.addf %40, %13 : vector<32x32xf32>
    %cst_22 = arith.constant dense<0xFF800000> : vector<32xf32>
    %42 = vector.multi_reduction <maximumf>, %41, %cst_22 [1] : vector<32x32xf32> to vector<32xf32>
    %43 = vector.shape_cast %42 : vector<32xf32> to vector<32x1xf32>
    %44 = vector.broadcast %43 : vector<32x1xf32> to vector<32x32xf32>
    %45 = arith.subf %41, %44 : vector<32x32xf32>
    %46 = math.exp %45 : vector<32x32xf32>
    %47 = arith.mulf %46, %12 : vector<32x32xf32>
    %cst_23 = arith.constant dense<0.000000e+00> : vector<32xf32>
    %48 = vector.multi_reduction <add>, %47, %cst_23 [1] : vector<32x32xf32> to vector<32xf32>
    %49 = vector.shape_cast %48 : vector<32xf32> to vector<32x1xf32>
    %cst_24 = arith.constant 1.000000e-30 : f32
    %50 = vector.broadcast %cst_24 : f32 to vector<32x1xf32>
    %51 = arith.maximumf %49, %50 : vector<32x1xf32>
    %cst_25 = arith.constant dense<0.000000e+00> : vector<32x64xf32>
    %52 = tpu.matmul %47, %39, %cst_25 {dimension_numbers = #tpu.dot_dimension_numbers<[1], [0], [0], [1], [0, 0, 1, 1], [], []>} : vector<32x32xf32>, vector<32x64xf32>, vector<32x64xf32> -> vector<32x64xf32>
    %53 = tpu.reciprocal %51 {approx = true} : vector<32x1xf32> -> vector<32x1xf32>
    %54 = vector.broadcast %53 : vector<32x1xf32> to vector<32x64xf32>
    %55 = arith.mulf %52, %54 : vector<32x64xf32>
    %56 = arith.addf %36, %55 : vector<32x64xf32>
    %57 = vector.extract_strided_slice %15 {offsets = [0, 16], sizes = [32, 8], strides = [1, 1]} : vector<32x32xf32> to vector<32x8xf32>
    %58 = vector.extract_strided_slice %14 {offsets = [0, 16], sizes = [32, 8], strides = [1, 1]} : vector<32x32xf32> to vector<32x8xf32>
    %59 = vector.extract_strided_slice %5 {offsets = [0, 160], sizes = [32, 64], strides = [1, 1]} : vector<32x288xf32> to vector<32x64xf32>
    %cst_26 = arith.constant dense<0.000000e+00> : vector<32x32xf32>
    %60 = tpu.matmul %57, %58, %cst_26 {dimension_numbers = #tpu.dot_dimension_numbers<[1], [1], [0], [0], [0, 0, 1, 0], [], []>} : vector<32x8xf32>, vector<32x8xf32>, vector<32x32xf32> -> vector<32x32xf32>
    %61 = arith.addf %60, %13 : vector<32x32xf32>
    %cst_27 = arith.constant dense<0xFF800000> : vector<32xf32>
    %62 = vector.multi_reduction <maximumf>, %61, %cst_27 [1] : vector<32x32xf32> to vector<32xf32>
    %63 = vector.shape_cast %62 : vector<32xf32> to vector<32x1xf32>
    %64 = vector.broadcast %63 : vector<32x1xf32> to vector<32x32xf32>
    %65 = arith.subf %61, %64 : vector<32x32xf32>
    %66 = math.exp %65 : vector<32x32xf32>
    %67 = arith.mulf %66, %12 : vector<32x32xf32>
    %cst_28 = arith.constant dense<0.000000e+00> : vector<32xf32>
    %68 = vector.multi_reduction <add>, %67, %cst_28 [1] : vector<32x32xf32> to vector<32xf32>
    %69 = vector.shape_cast %68 : vector<32xf32> to vector<32x1xf32>
    %cst_29 = arith.constant 1.000000e-30 : f32
    %70 = vector.broadcast %cst_29 : f32 to vector<32x1xf32>
    %71 = arith.maximumf %69, %70 : vector<32x1xf32>
    %cst_30 = arith.constant dense<0.000000e+00> : vector<32x64xf32>
    %72 = tpu.matmul %67, %59, %cst_30 {dimension_numbers = #tpu.dot_dimension_numbers<[1], [0], [0], [1], [0, 0, 1, 1], [], []>} : vector<32x32xf32>, vector<32x64xf32>, vector<32x64xf32> -> vector<32x64xf32>
    %73 = tpu.reciprocal %71 {approx = true} : vector<32x1xf32> -> vector<32x1xf32>
    %74 = vector.broadcast %73 : vector<32x1xf32> to vector<32x64xf32>
    %75 = arith.mulf %72, %74 : vector<32x64xf32>
    %76 = arith.addf %56, %75 : vector<32x64xf32>
    %77 = vector.extract_strided_slice %15 {offsets = [0, 24], sizes = [32, 8], strides = [1, 1]} : vector<32x32xf32> to vector<32x8xf32>
    %78 = vector.extract_strided_slice %14 {offsets = [0, 24], sizes = [32, 8], strides = [1, 1]} : vector<32x32xf32> to vector<32x8xf32>
    %79 = vector.extract_strided_slice %5 {offsets = [0, 224], sizes = [32, 64], strides = [1, 1]} : vector<32x288xf32> to vector<32x64xf32>
    %cst_31 = arith.constant dense<0.000000e+00> : vector<32x32xf32>
    %80 = tpu.matmul %77, %78, %cst_31 {dimension_numbers = #tpu.dot_dimension_numbers<[1], [1], [0], [0], [0, 0, 1, 0], [], []>} : vector<32x8xf32>, vector<32x8xf32>, vector<32x32xf32> -> vector<32x32xf32>
    %81 = arith.addf %80, %13 : vector<32x32xf32>
    %cst_32 = arith.constant dense<0xFF800000> : vector<32xf32>
    %82 = vector.multi_reduction <maximumf>, %81, %cst_32 [1] : vector<32x32xf32> to vector<32xf32>
    %83 = vector.shape_cast %82 : vector<32xf32> to vector<32x1xf32>
    %84 = vector.broadcast %83 : vector<32x1xf32> to vector<32x32xf32>
    %85 = arith.subf %81, %84 : vector<32x32xf32>
    %86 = math.exp %85 : vector<32x32xf32>
    %87 = arith.mulf %86, %12 : vector<32x32xf32>
    %cst_33 = arith.constant dense<0.000000e+00> : vector<32xf32>
    %88 = vector.multi_reduction <add>, %87, %cst_33 [1] : vector<32x32xf32> to vector<32xf32>
    %89 = vector.shape_cast %88 : vector<32xf32> to vector<32x1xf32>
    %cst_34 = arith.constant 1.000000e-30 : f32
    %90 = vector.broadcast %cst_34 : f32 to vector<32x1xf32>
    %91 = arith.maximumf %89, %90 : vector<32x1xf32>
    %cst_35 = arith.constant dense<0.000000e+00> : vector<32x64xf32>
    %92 = tpu.matmul %87, %79, %cst_35 {dimension_numbers = #tpu.dot_dimension_numbers<[1], [0], [0], [1], [0, 0, 1, 1], [], []>} : vector<32x32xf32>, vector<32x64xf32>, vector<32x64xf32> -> vector<32x64xf32>
    %93 = tpu.reciprocal %91 {approx = true} : vector<32x1xf32> -> vector<32x1xf32>
    %94 = vector.broadcast %93 : vector<32x1xf32> to vector<32x64xf32>
    %95 = arith.mulf %92, %94 : vector<32x64xf32>
    %96 = arith.addf %76, %95 : vector<32x64xf32>
    %cst_36 = arith.constant 0.000000e+00 : f32
    %97 = vector.broadcast %cst_36 : f32 to vector<32x64xf32>
    %98 = arith.maximumf %96, %97 : vector<32x64xf32>
    %c0_37 = arith.constant 0 : index
    %c0_38 = arith.constant 0 : index
    %99 = vector.load %arg9[%c0_37, %c0_38] : memref<64x128xf32, #tpu.memory_space<vmem>>, vector<64x128xf32>
    %cst_39 = arith.constant dense<0.000000e+00> : vector<32x128xf32>
    %100 = tpu.matmul %98, %99, %cst_39 {dimension_numbers = #tpu.dot_dimension_numbers<[1], [0], [0], [1], [0, 0, 1, 1], [], []>} : vector<32x64xf32>, vector<64x128xf32>, vector<32x128xf32> -> vector<32x128xf32>
    %c0_40 = arith.constant 0 : index
    %c0_41 = arith.constant 0 : index
    %101 = vector.load %arg10[%c0_40, %c0_41] : memref<1x128xf32, #tpu.memory_space<vmem>>, vector<1x128xf32>
    %102 = vector.broadcast %101 : vector<1x128xf32> to vector<32x128xf32>
    %103 = arith.addf %100, %102 : vector<32x128xf32>
    %cst_42 = arith.constant 0.000000e+00 : f32
    %104 = vector.broadcast %cst_42 : f32 to vector<32x128xf32>
    %105 = arith.maximumf %103, %104 : vector<32x128xf32>
    %c0_43 = arith.constant 0 : index
    %c0_44 = arith.constant 0 : index
    %106 = vector.load %arg11[%c0_43, %c0_44] : memref<32x128xf32, #tpu.memory_space<vmem>>, vector<32x128xf32>
    tpu.vector_store %arg11[%c0_43, %c0_44], %105 {strides = array<i32>} : memref<32x128xf32, #tpu.memory_space<vmem>>, vector<32x128xf32>,
    return
  }
  func.func @transform_0(%arg0: i32) -> (i32, i32) {
    %c0_i32 = arith.constant 0 : i32
    %c0_i32_0 = arith.constant 0 : i32
    %c0_i32_1 = arith.constant 0 : i32
    return %c0_i32, %c0_i32_0 : i32, i32
  }
  func.func @transform_1(%arg0: i32) -> (i32, i32) {
    %c0_i32 = arith.constant 0 : i32
    %c0_i32_0 = arith.constant 0 : i32
    return %arg0, %c0_i32 : i32, i32
  }
  func.func @transform_2(%arg0: i32) -> (i32, i32) {
    %c0_i32 = arith.constant 0 : i32
    %c0_i32_0 = arith.constant 0 : i32
    return %arg0, %c0_i32 : i32, i32
  }
  func.func @transform_3(%arg0: i32) -> (i32, i32) {
    %c0_i32 = arith.constant 0 : i32
    %c0_i32_0 = arith.constant 0 : i32
    return %arg0, %c0_i32 : i32, i32
  }
  func.func @transform_4(%arg0: i32) -> (i32, i32) {
    %c0_i32 = arith.constant 0 : i32
    %c0_i32_0 = arith.constant 0 : i32
    %c0_i32_1 = arith.constant 0 : i32
    return %c0_i32, %c0_i32_0 : i32, i32
  }
  func.func @transform_5(%arg0: i32) -> (i32, i32) {
    %c0_i32 = arith.constant 0 : i32
    %c0_i32_0 = arith.constant 0 : i32
    %c0_i32_1 = arith.constant 0 : i32
    return %c0_i32, %c0_i32_0 : i32, i32
  }
  func.func @transform_6(%arg0: i32) -> (i32, i32) {
    %c0_i32 = arith.constant 0 : i32
    %c0_i32_0 = arith.constant 0 : i32
    %c0_i32_1 = arith.constant 0 : i32
    return %c0_i32, %c0_i32_0 : i32, i32
  }
  func.func @transform_7(%arg0: i32) -> (i32, i32) {
    %c0_i32 = arith.constant 0 : i32
    %c0_i32_0 = arith.constant 0 : i32
    %c0_i32_1 = arith.constant 0 : i32
    return %c0_i32, %c0_i32_0 : i32, i32
  }
  func.func @transform_8(%arg0: i32) -> (i32, i32) {
    %c0_i32 = arith.constant 0 : i32
    %c0_i32_0 = arith.constant 0 : i32
    %c0_i32_1 = arith.constant 0 : i32
    return %c0_i32, %c0_i32_0 : i32, i32
  }
  func.func @transform_9(%arg0: i32) -> (i32, i32) {
    %c0_i32 = arith.constant 0 : i32
    %c0_i32_0 = arith.constant 0 : i32
    %c0_i32_1 = arith.constant 0 : i32
    return %c0_i32, %c0_i32_0 : i32, i32
  }
  func.func @transform_10(%arg0: i32) -> (i32, i32) {
    %c0_i32 = arith.constant 0 : i32
    %c0_i32_0 = arith.constant 0 : i32
    return %arg0, %c0_i32 : i32, i32
  }
}

</mosaic_0001>

<bundles_post_ra>
// kernel: graph_transformer_layer.1
= control target key start
LH: loop header
LB: loop body
LE: loop exit
PB: predicated region body
PF: predicated region fallthrough
CT: control target
= control target key end

     0   :  { %15 = vsyncpa [#allocation3], 0  ;;  %s2056_s0 = inlined_call_operand.vmem [shape: f32[32,4], index: 0, kind: input, shape index: {}, may-alias: {0,1}]   ;;  %s2057_s1 = inlined_call_operand.vmem [shape: f32[32,4], index: 1, kind: input, shape index: {}, may-alias: {0,1}]   ;;  %s2058_s2 = inlined_call_operand.vmem [shape: f32[32,32], index: 2, kind: input, shape index: {}]   ;;  %s2059_s3 = inlined_call_operand.hbm [shape: f32[32,32], index: 3, kind: input, shape index: {}]   ;;  %s2060_s4 = inlined_call_operand.vmem [shape: f32[4,288], index: 4, kind: input, shape index: {}]   ;;  %s2061_s5 = inlined_call_operand.hbm [shape: f32[1,288], index: 5, kind: input, shape index: {}]   ;;  %s2062_s6 = inlined_call_operand.hbm [shape: f32[4,96], index: 6, kind: input, shape index: {}]   ;;  %s2063_s7 = inlined_call_operand.vmem [shape: f32[1,96], index: 7, kind: input, shape index: {}]   ;;  %s2064_s8 = inlined_call_operand.hbm [shape: f32[64,128], index: 8, kind: input, shape index: {}]   ;;  %s2065_s9 = inlined_call_operand.vmem [shape: f32[1,128], index: 9, kind: input, shape index: {}]   ;;  %s2066_s10 = inlined_call_operand.hbm [shape: f32[32,128], index: 10, kind: output, shape index: {}]  }
   0x1   :  { %16 = vsyncpa [#allocation6], 0 }
   0x2   :  { %17 = vsyncpa [#allocation9], 0  ;;  %s45_s15 = sshll.u32 %s2061_s5, 4  ;;  %s46_s15 = int_to_ptr.hbm [resolvable:$true] %s45_s15 }
   0x3   :  { %18 = vsyncpa [#allocation4], 0  ;;  %s1480_s16 = smov [#allocation5]   ;;  %s29_s20 = sshll.u32 %s2059_s3, 4  ;;  %s30_s20 = int_to_ptr.hbm [resolvable:$true] %s29_s20 }
   0x4   :  { %s47_s17 = sshll.u32 %s1480_s16, 4  ;;  %s1481_s21 = smov [#allocation2]   ;;  %s48_s17 = int_to_ptr.vmem [resolvable:$true] %s47_s17 }
   0x5   :  { %50 = dma.hbm_to_vmem [thread:$0]  %s46_s15, 48, %s48_s17, [#allocation6]  }
   0x6   :  { %s31_s22 = sshll.u32 %s1481_s21, 4  ;;  %s1482_s23 = smov 128   ;;  %s32_s22 = int_to_ptr.vmem [resolvable:$true] %s31_s22 }
   0x7   :  { %s1483_s24 = smov 8   ;;  %s56_s26 = sshll.u32 %s2062_s6, 4  ;;  %s57_s26 = int_to_ptr.hbm [resolvable:$true] %s56_s26 }
   0x8   :  { %37 = dma.hbm_to_vmem [thread:$0]  %s30_s20, 512, %s32_s22, [#allocation3], %s1482_s23, %s1482_s23, %s1483_s24  }
   0x9   :  { %s1484_s27 = smov [#allocation7]   ;;  %s68_s30 = sshll.u32 %s2064_s8, 4  ;;  %s69_s30 = int_to_ptr.hbm [resolvable:$true] %s68_s30 }
   0xa   :  { %s58_s28 = sshll.u32 %s1484_s27, 4  ;;  %s1485_s11 = smov [#allocation8]   ;;  %s59_s28 = int_to_ptr.vmem [resolvable:$true] %s58_s28 }
   0xb   :  { %61 = dma.hbm_to_vmem [thread:$0]  %s57_s26, 64, %s59_s28, [#allocation6]  }
   0xc   :  { %s70_s12 = sshll.u32 %s1485_s11, 4  ;;  %s71_s12 = int_to_ptr.vmem [resolvable:$true] %s70_s12 }
   0xd   :  { %76 = dma.hbm_to_vmem [thread:$0]  %s69_s30, 1024, %s71_s12, [#allocation9], %s1482_s23, %s1482_s23, %s1483_s24  }
   0xe   :  { %1472 = dma.done.wait [#allocation3], 512  }
   0xf   :  { %1473 = vsyncadd [#allocation3], 4294966784 }
  0x10   :  { %1474 = dma.done.wait [#allocation6], 112  }
  0x11   :  { %1475 = vsyncadd [#allocation6], 4294967184 }
  0x12   :  { %1476 = dma.done.wait [#allocation9], 1024  }
  0x13   :  { %1477 = vsyncadd [#allocation9], 4294966272  ;;  %v99_v0 = vld [vmem:[%s2060_s4] sm:$0xff]  ;;  %vm130_vm0 = vcmask 1043456   ;;  %vm117_vm1 = vcmask 31744   ;;  %v1576_v3 = vld [vmem:[%s2056_s0 + $0x10] sm:$0xff] }
  0x14   :  { %111 = vst [vmem:[#allocation1] ss:$2 sm:$0xff] %v99_v0  ;;  %v1571_v1 = vld [vmem:[%s2056_s0] sm:$0xff]  ;;  %v1581_v4 = vld [vmem:[%s2056_s0 + $0x18] sm:$0xff]  ;;  %v228_v6 = vld [vmem:[#allocation7] sm:$0xf] }
  0x15   :  { %v1597_v7 = vld [vmem:[%s2056_s0 + $0x8] sm:$0xff]  ;;  %v224_v8 = vld [vmem:[%s2057_s1] sm:$0xff]  ;;  %v226_v10 = vld [vmem:[%s2057_s1 + $0x10] sm:$0xff]  ;;  %vm285_vm2 = vcmask 64512   ;;  %s1488_s30 = smov 112   ;;  %s1489_s6 = smov 32  }
  0x16   :  { %v225_v9 = vld [vmem:[%s2057_s1 + $0x8] sm:$0xff]  ;;  %v227_v11 = vld [vmem:[%s2057_s1 + $0x18] sm:$0xff]  ;;  %s1486_s1 = smov 120   ;;  %v1286_v25 = vld [vmem:[%s2063_s7] ss:$0 sm:$0xff]  ;;  %s1487_s7 = smov 104  }
  0x17   :  { %v1625_v13 = vld [vmem:[#allocation5] sm:$0x7]  ;;  %vm339_vm3 = vcmask 261120   ;;  %vm1075_vm4 = vcmask 523264   ;;  %s1491_s21 = smov [#allocation10]   ;;  %s1127_s0 = sshll.u32 %s2066_s10, 4  ;;  %s1128_s0 = int_to_ptr.hbm [resolvable:$true] %s1127_s0 }
  0x18   :  { %v103_v15 = vperm.slane %v1625_v13, 0  ;;  %v104_v26 = vperm.slane %v1625_v13, 1  ;;  %v100_v44 = vld [vmem:[%s2060_s4 + $0x8] sm:$0xf]  ;;  %s1490_s4 = smov 96   ;;  %s1125_s22 = sshll.u32 %s1491_s21, 4  ;;  %s1126_s22 = int_to_ptr.vmem [resolvable:$true] %s1125_s22 }
  0x19   :  { %113 = vst [vmem:[#allocation1 + $0x10] ss:$2 sm:$0xff] %v100_v44  ;;  %v1752_v0 = vld [vmem:[#allocation2] sm:$0xff] }
  0x1b   :  { %v114_v2 = vld.sshfl [vmem:[#allocation1] sm:$0xff pattern:$0x75316420]  ;;  %v115_v5 = vld.sshfl [vmem:[#allocation1 + $0x8] sm:$0xff pattern:$0x75316420] }
  0x1c   :  { %1142 = vmatpush.msk.msra.mxu0 %vm130_vm0, %v114_v2  ;;  %1214 = vmatpush.msk.msra.mxu1 %vm130_vm0, %v114_v2 }
  0x1d   :  { %1215 = vmatpush.msk.msra.mxu3 %vm130_vm0, %v114_v2  ;;  %1143 = vmatmul.msk.f32.vlgmr.msra.gmra.mxu0 %vm117_vm1, %v1571_v1 }
  0x1e   :  { %1145 = vmatmul.msk.f32.vlgmr.msra.gmra.mxu1 %vm117_vm1, %v1576_v3  ;;  %1146 = vmatmul.msk.f32.vlgmr.msra.gmra.mxu3 %vm117_vm1, %v1581_v4 }
  0x1f   :  { %1147 = vmatpush.msk.msrb.mxu1 %vm130_vm0, %v115_v5  ;;  %1157 = vmatpush.msk.msrb.mxu3 %vm130_vm0, %v228_v6 }
  0x20   :  { %v116_v47 = vld.sshfl [vmem:[#allocation1 + $0x10] sm:$0xff pattern:$0x75316420] }
  0x21   :  { %1152 = vmatpush.msk.msra.mxu2 %vm130_vm0, %v116_v47 }
  0x22   :  { %1153 = vmatmul.msk.f32.vlgmr.msra.gmra.mxu2 %vm117_vm1, %v1571_v1 }
  0x25   :  { %1144 = vmatmul.msk.f32.gmra.mxu0 %vm117_vm1, %v1597_v7 }
  0x26   :  { %1148 = vmatmul.msk.f32.vlgmr.msrb.gmra.mxu1 %vm117_vm1, %v1571_v1  ;;  %1158 = vmatmul.msk.f32.vlgmr.msrb.gmra.mxu3 %vm117_vm1, %v224_v8 }
  0x2a   :  { %1154 = vmatmul.msk.f32.gmra.mxu2 %vm117_vm1, %v1597_v7 }
  0x2e   :  { %1149 = vmatmul.msk.f32.gmra.mxu1 %vm117_vm1, %v1597_v7  ;;  %1159 = vmatmul.msk.f32.gmra.mxu3 %vm117_vm1, %v225_v9  ;;  %v1762_v7 = vld [vmem:[#allocation2 + $0x8] sm:$0xff] }
  0x32   :  { %1155 = vmatmul.msk.f32.gmra.mxu2 %vm117_vm1, %v1576_v3 }
  0x36   :  { %1150 = vmatmul.msk.f32.gmra.mxu1 %vm117_vm1, %v1576_v3  ;;  %1160 = vmatmul.msk.f32.gmra.mxu3 %vm117_vm1, %v226_v10 }
  0x3a   :  { %1156 = vmatmul.msk.f32.gmra.mxu2 %vm117_vm1, %v1581_v4 }
  0x3e   :  { %1151 = vmatmul.msk.f32.gmra.mxu1 %vm117_vm1, %v1581_v4  ;;  %1161 = vmatmul.msk.f32.gmra.mxu3 %vm117_vm1, %v227_v11 }
  0x9a   :  { %v154_v12 = vpop.f32.mrf.mxu0 }
  0x9b   :  { %v160_v14 = vpop.f32.mrf.mxu1  ;;  %v1632_v20 = vadd.f32 %v154_v12, %v103_v15 }
  0x9c   :  { %v1628_v16 = vadd.f32 %v160_v14, %v103_v15 }
  0xa1   :  { %v163_v17 = vpop.f32.mrf.mxu3 }
  0xa2   :  { %v1630_v18 = vadd.f32 %v163_v17, %v103_v15  ;;  %v157_v19 = vpop.f32.mrf.mxu0 }
  0xa3   :  { %v1634_v21 = vadd.f32 %v157_v19, %v103_v15  ;;  %v183_v22 = vpop.f32.mrf.mxu1  ;;  %v1771_v15 = vld [vmem:[#allocation2 + $0x10] sm:$0xff] }
  0xa4   :  { %479 = vrot.lane.b32.xlu0 %v1630_v18, %s1486_s1  ;;  %1162 = vmatpush.xpose.msk.msrb.mxu0 %vm285_vm2, %v1630_v18  ;;  %v1251_v23 = vpack.i.bf16 %v1628_v16, %v1630_v18  ;;  %v1654_v30 = vadd.f32 %v183_v22, %v104_v26 }
  0xa5   :  { %475 = vrot.lane.b32.xlu1 %v1634_v21, %s1486_s1  ;;  %v1261_v24 = vpack.i.bf16 %v1632_v20, %v1634_v21 }
  0xa6   :  { %v1256_v49 = vpack.i.bf16 %v1654_v30, %v1632_v20 }
  0xa8   :  { %1163 = vmatpush.xpose.msk.msrb.mxu0 %vm285_vm2, %v1628_v16 }
  0xa9   :  { %v265_v27 = vpop.f32.mrf.mxu3 }
  0xaa   :  { %v1652_v28 = vadd.f32 %v1286_v25, %v265_v27 }
  0xab   :  { %v186_v29 = vpop.f32.mrf.mxu1 }
  0xac   :  { %v1656_v31 = vadd.f32 %v186_v29, %v104_v26  ;;  %465 = vrot.lane.b32.xlu2 %v1652_v28, %s1486_s1  ;;  %477 = vrot.lane.b32.xlu0 %v1628_v16, %s1486_s1 }
  0xad   :  { %1164 = vmatpush.xpose.msk.msrb.mxu0 %vm285_vm2, %v1634_v21  ;;  %473 = vrot.lane.b32.xlu1 %v1632_v20, %s1486_s1 }
  0xae   :  { %v1281_v32 = vpack.i.bf16 %v1654_v30, %v1656_v31  ;;  %v1246_v45 = vpack.i.bf16 %v1656_v31, %v1634_v21 }
  0xb1   :  { %1165 = vmatpush.xpose.msk.msrb.mxu0 %vm285_vm2, %v1632_v20  ;;  %v268_v33 = vpop.f32.mrf.mxu3 }
  0xb2   :  { %v1670_v34 = vadd.f32 %v1286_v25, %v268_v33 }
  0xb3   :  { %v189_v35 = vpop.f32.mrf.mxu1 }
  0xb4   :  { %1166 = vmatmul.msk.f32.vlgmr.msrb.gmra.mxu0 %vm285_vm2, %v1652_v28  ;;  %467 = vrot.lane.b32.xlu2 %v1670_v34, %s1486_s1  ;;  %v1680_v39 = vadd.f32 %v189_v35, %v104_v26 }
  0xb5   :  { %861 = vrot.lane.b32.xlu0 %v1632_v20, %s1487_s7  ;;  %867 = vrot.lane.b32.xlu1 %v1630_v18, %s1487_s7 }
  0xb6   :  { %v1241_v46 = vpack.i.bf16 %v1680_v39, %v1628_v16 }
  0xb9   :  { %v271_v36 = vpop.f32.mrf.mxu3 }
  0xba   :  { %v1678_v37 = vadd.f32 %v1286_v25, %v271_v36 }
  0xbb   :  { %v192_v38 = vpop.f32.mrf.mxu1 }
  0xbc   :  { %v1682_v40 = vadd.f32 %v192_v38, %v104_v26  ;;  %1167 = vmatmul.msk.f32.gmra.mxu0 %vm285_vm2, %v1670_v34  ;;  %865 = vrot.lane.b32.xlu2 %v1628_v16, %s1487_s7 }
  0xbd   :  { %469 = vrot.lane.b32.xlu0 %v1678_v37, %s1486_s1  ;;  %863 = vrot.lane.b32.xlu1 %v1634_v21, %s1487_s7 }
  0xbe   :  { %v1276_v41 = vpack.i.bf16 %v1680_v39, %v1682_v40  ;;  %v1236_v48 = vpack.i.bf16 %v1682_v40, %v1630_v18 }
  0xc1   :  { %v274_v42 = vpop.f32.mrf.mxu3 }
  0xc2   :  { %v1692_v43 = vadd.f32 %v1286_v25, %v274_v42 }
  0xc4   :  { %1168 = vmatmul.msk.f32.gmra.mxu0 %vm285_vm2, %v1678_v37  ;;  %681 = vrot.lane.b32.xlu2 %v1630_v18, %s1488_s30 }
  0xc5   :  { %471 = vrot.lane.b32.xlu0 %v1692_v43, %s1486_s1  ;;  %679 = vrot.lane.b32.xlu1 %v1628_v16, %s1488_s30 }
  0xcc   :  { %1169 = vmatmul.msk.f32.gmra.mxu0 %vm285_vm2, %v1692_v43  ;;  %853 = vrot.lane.b32.xlu2 %v1652_v28, %s1487_s7 }
  0xcd   :  { %677 = vrot.lane.b32.xlu0 %v1634_v21, %s1488_s30  ;;  %675 = vrot.lane.b32.xlu1 %v1632_v20, %s1488_s30 }
  0xd4   :  { %855 = vrot.lane.b32.xlu2 %v1670_v34, %s1487_s7 }
  0xd5   :  { %667 = vrot.lane.b32.xlu0 %v1652_v28, %s1488_s30  ;;  %857 = vrot.lane.b32.xlu1 %v1678_v37, %s1487_s7 }
  0xdc   :  { %669 = vrot.lane.b32.xlu2 %v1670_v34, %s1488_s30 }
  0xdd   :  { %859 = vrot.lane.b32.xlu0 %v1692_v43, %s1487_s7  ;;  %671 = vrot.lane.b32.xlu1 %v1678_v37, %s1488_s30 }
  0xe4   :  { %673 = vrot.lane.b32.xlu2 %v1692_v43, %s1488_s30 }
  0xe5   :  { %1242 = vrot.lane.b32.xlu0 %v1241_v46, %s1489_s6  ;;  %1247 = vrot.lane.b32.xlu1 %v1246_v45, %s1489_s6 }
  0xec   :  { %1237 = vrot.lane.b32.xlu2 %v1236_v48, %s1489_s6 }
  0xed   :  { %1257 = vrot.lane.b32.xlu1 %v1256_v49, %s1489_s6 }
  0xf4   :  { %1252 = vrot.lane.b32.xlu2 %v1251_v23, %s1490_s4 }
  0xfc   :  { %1262 = vrot.lane.b32.xlu2 %v1261_v24, %s1490_s4  ;;  %v1785_v24 = vld [vmem:[#allocation2 + $0x18] sm:$0xff] }
 0x106   :  { %v466_v50 = vpop.permute.xlu2 %465 }
 0x10e   :  { %v468_v51 = vpop.permute.xlu2 %467 }
 0x116   :  { %v480_v52 = vpop.permute.xlu0 %479  ;;  %v866_v53 = vpop.permute.xlu2 %865 }
 0x117   :  { %v476_v54 = vpop.permute.xlu1 %475  ;;  %1174 = vmatpush.xpose.msk.msrb.mxu2 %vm285_vm2, %v480_v52 }
 0x11e   :  { %v682_v55 = vpop.permute.xlu2 %681  ;;  %v478_v56 = vpop.permute.xlu0 %477 }
 0x11f   :  { %1175 = vmatpush.xpose.msk.msrb.mxu2 %vm285_vm2, %v478_v56  ;;  %1186 = vmatpush.xpose.msk.msra.mxu0 %vm285_vm2, %v682_v55  ;;  %v474_v57 = vpop.permute.xlu1 %473 }
 0x123   :  { %1176 = vmatpush.xpose.msk.msrb.mxu2 %vm285_vm2, %v476_v54 }
 0x126   :  { %v854_v58 = vpop.permute.xlu2 %853 }
 0x127   :  { %v862_v59 = vpop.permute.xlu0 %861  ;;  %1177 = vmatpush.xpose.msk.msrb.mxu2 %vm285_vm2, %v474_v57  ;;  %v868_v60 = vpop.permute.xlu1 %867 }
 0x12a   :  { %1178 = vmatmul.msk.f32.vlgmr.msrb.gmra.mxu2 %vm285_vm2, %v466_v50 }
 0x12b   :  { %1198 = vmatpush.xpose.msk.msra.mxu2 %vm285_vm2, %v868_v60  ;;  %v105_v60 = vperm.slane %v1625_v13, 2  ;;  %v1835_v13 = vld [vmem:[%s2058_s2] sm:$0xff] }
 0x12e   :  { %v856_v61 = vpop.permute.xlu2 %855 }
 0x12f   :  { %1199 = vmatpush.xpose.msk.msra.mxu2 %vm285_vm2, %v866_v53  ;;  %v470_v62 = vpop.permute.xlu0 %469  ;;  %v864_v63 = vpop.permute.xlu1 %863 }
 0x131   :  { %v327_v1 = vpop.f32.mrf.mxu0 }
 0x132   :  { %v1756_v2 = vadd.f32 %v327_v1, %v1752_v0  ;;  %1179 = vmatmul.msk.f32.gmra.mxu2 %vm285_vm2, %v468_v51 }
 0x133   :  { %1200 = vmatpush.xpose.msk.msra.mxu2 %vm285_vm2, %v864_v63 }
 0x134   :  { %v340_v3 = vsel %vm339_vm3, %v1756_v2, -inf }
 0x135   :  { %341 = vmax.xlane.f32.xlu1 %v340_v3 }
 0x136   :  { %v670_v4 = vpop.permute.xlu2 %669 }
 0x137   :  { %1201 = vmatpush.xpose.msk.msra.mxu2 %vm285_vm2, %v862_v59  ;;  %v472_v5 = vpop.permute.xlu0 %471  ;;  %v680_v6 = vpop.permute.xlu1 %679 }
 0x138   :  { %1187 = vmatpush.xpose.msk.msra.mxu0 %vm285_vm2, %v680_v6  ;;  %v212_v59 = vpop.f32.mrf.mxu2 }
 0x139   :  { %v330_v8 = vpop.f32.mrf.mxu0 }
 0x13a   :  { %v1766_v9 = vadd.f32 %v330_v8, %v1762_v7  ;;  %1180 = vmatmul.msk.f32.gmra.mxu2 %vm285_vm2, %v470_v62 }
 0x13c   :  { %v343_v10 = vsel %vm339_vm3, %v1766_v9, -inf }
 0x13d   :  { %344 = vmax.xlane.f32.xlu0 %v343_v10 }
 0x13e   :  { %v674_v11 = vpop.permute.xlu2 %673 }
 0x13f   :  { %v678_v12 = vpop.permute.xlu0 %677  ;;  %v676_v14 = vpop.permute.xlu1 %675 }
 0x140   :  { %1188 = vmatpush.xpose.msk.msra.mxu0 %vm285_vm2, %v678_v12  ;;  %v215_v62 = vpop.f32.mrf.mxu2 }
 0x141   :  { %v333_v16 = vpop.f32.mrf.mxu0  ;;  %v1827_v63 = vadd.f32 %v215_v62, %v105_v60 }
 0x142   :  { %v1775_v17 = vadd.f32 %v333_v16, %v1771_v15  ;;  %1181 = vmatmul.msk.f32.gmra.mxu2 %vm285_vm2, %v472_v5 }
 0x144   :  { %1189 = vmatpush.xpose.msk.msra.mxu0 %vm285_vm2, %v676_v14  ;;  %v346_v18 = vsel %vm339_vm3, %v1775_v17, -inf }
 0x145   :  { %347 = vmax.xlane.f32.xlu2 %v346_v18 }
 0x146   :  { %v1781_v19 = vpop.permute.xlu2 %1237 }
 0x147   :  { %v1240_v20 = vunpack.i.h.bf16 %v1781_v19  ;;  %v1239_v21 = vunpack.i.l.bf16 %v1781_v19  ;;  %v668_v22 = vpop.permute.xlu0 %667  ;;  %v858_v23 = vpop.permute.xlu1 %857 }
 0x148   :  { %1190 = vmatmul.msk.f32.vlgmr.msra.gmra.mxu0 %vm285_vm2, %v668_v22  ;;  %v218_v3 = vpop.f32.mrf.mxu2 }
 0x149   :  { %v336_v25 = vpop.f32.mrf.mxu0  ;;  %v593_v26 = vsel %vm339_vm3, %v1239_v21, %v1240_v20 }
 0x14a   :  { %v1792_v27 = vadd.f32 %v336_v25, %v1785_v24  ;;  %622 = vmatpush.msra.mxu3 %v593_v26  ;;  %1202 = vmatmul.msk.f32.vlgmr.msra.gmra.mxu2 %vm285_vm2, %v854_v58 }
 0x14c   :  { %v349_v29 = vsel %vm339_vm3, %v1792_v27, -inf }
 0x14d   :  { %350 = vmax.xlane.f32.xlu0 %v349_v29 }
 0x14e   :  { %v1253_v33 = vpop.permute.xlu2 %1252 }
 0x14f   :  { %v1254_v35 = vunpack.i.l.bf16 %v1253_v33  ;;  %v860_v36 = vpop.permute.xlu0 %859  ;;  %v672_v38 = vpop.permute.xlu1 %671  ;;  %v1255_v42 = vunpack.i.h.bf16 %v1253_v33 }
 0x150   :  { %1191 = vmatmul.msk.f32.gmra.mxu0 %vm285_vm2, %v670_v4  ;;  %v221_v4 = vpop.f32.mrf.mxu2 }
 0x151   :  { %420 = vmatpush.msra.mxu1 %v1254_v35  ;;  %v222_v62 = vadd.f32 %v221_v4, %v105_v60 }
 0x152   :  { %1203 = vmatmul.msk.f32.gmra.mxu2 %vm285_vm2, %v856_v61  ;;  %v1825_v61 = vadd.f32 %v212_v59, %v105_v60  ;;  %v219_v59 = vadd.f32 %v218_v3, %v105_v60 }
 0x153   :  { %421 = vmatpush.msra.mxu1 %v1255_v42 }
 0x154   :  { %v1271_v1 = vpack.i.bf16 %v1825_v61, %v1827_v63 }
 0x156   :  { %v1263_v44 = vpop.permute.xlu2 %1262 }
 0x157   :  { %v1264_v45 = vunpack.i.l.bf16 %v1263_v44  ;;  %v1799_v46 = vpop.permute.xlu0 %1242  ;;  %v1801_v47 = vpop.permute.xlu1 %1247  ;;  %v1265_v52 = vunpack.i.h.bf16 %v1263_v44  ;;  %v1868_v44 = vld [vmem:[%s2058_s2 + $0x10] sm:$0xff] }
 0x158   :  { %v1245_v48 = vunpack.i.h.bf16 %v1799_v46  ;;  %v1244_v49 = vunpack.i.l.bf16 %v1799_v46  ;;  %1192 = vmatmul.msk.f32.gmra.mxu0 %vm285_vm2, %v672_v38  ;;  %v1250_v50 = vunpack.i.h.bf16 %v1801_v47  ;;  %v1249_v51 = vunpack.i.l.bf16 %v1801_v47 }
 0x159   :  { %422 = vmatpush.msra.mxu1 %v1264_v45 }
 0x15a   :  { %v592_v53 = vsel %vm339_vm3, %v1244_v49, %v1245_v48  ;;  %1204 = vmatmul.msk.f32.gmra.mxu2 %vm285_vm2, %v858_v23  ;;  %v591_v54 = vsel %vm339_vm3, %v1249_v51, %v1250_v50 }
 0x15b   :  { %623 = vmatpush.msra.mxu3 %v592_v53  ;;  %423 = vmatpush.msra.mxu1 %v1265_v52 }
 0x15d   :  { %624 = vmatpush.msra.mxu3 %v591_v54 }
 0x15f   :  { %v1815_v55 = vpop.permute.xlu1 %1257 }
 0x160   :  { %1193 = vmatmul.msk.f32.gmra.mxu0 %vm285_vm2, %v674_v11  ;;  %v1260_v56 = vunpack.i.h.bf16 %v1815_v55  ;;  %v1259_v57 = vunpack.i.l.bf16 %v1815_v55 }
 0x162   :  { %1205 = vmatmul.msk.f32.gmra.mxu2 %vm285_vm2, %v860_v36  ;;  %v590_v58 = vsel %vm339_vm3, %v1259_v57, %v1260_v56 }
 0x163   :  { %625 = vmatpush.msra.mxu3 %v590_v58 }
 0x1a8   :  { %v342_v5 = vpop.xlane.xlu1 %341 }
 0x1a9   :  { %v352_v6 = vsub.f32 %v1756_v2, %v342_v5 }
 0x1ab   :  { %v356_v8 = vmul.f32 1.442695, %v352_v6 }
 0x1ad   :  { %1288 = vpow2.f32 %v356_v8  ;;  %v514_v10 = vpop.f32.mrf.mxu2 }
 0x1ae   :  { %v515_v5 = vadd.f32 %v514_v10, %v1752_v0 }
 0x1b0   :  { %v345_v11 = vpop.xlane.xlu0 %344 }
 0x1b1   :  { %v353_v12 = vsub.f32 %v1766_v9, %v345_v11  ;;  %v1852_v9 = vld [vmem:[%s2058_s2 + $0x8] sm:$0xff] }
 0x1b3   :  { %v1289_v14 = vpop.eup %1288  ;;  %v358_v16 = vmul.f32 1.442695, %v353_v12  ;;  %v1266_v12 = vpack.i.bf16 %v219_v59, %v222_v62 }
 0x1b4   :  { %v1839_v18 = vmul.f32 %v1289_v14, %v1835_v13  ;;  %v526_v14 = vsel %vm339_vm3, %v515_v5, -inf }
 0x1b5   :  { %1290 = vpow2.f32 %v358_v16  ;;  %v517_v21 = vpop.f32.mrf.mxu2 }
 0x1b6   :  { %1170 = vmatmul.msk.f32.vlgmr.msra.gmra.mxu1 %vm339_vm3, %v1839_v18  ;;  %v1844_v2 = vadd.f32 %v517_v21, %v1762_v7 }
 0x1b8   :  { %v348_v22 = vpop.xlane.xlu2 %347  ;;  %v529_v23 = vsel %vm339_vm3, %v1844_v2, -inf }
 0x1b9   :  { %v354_v25 = vsub.f32 %v1775_v17, %v348_v22  ;;  %530 = vmax.xlane.f32.xlu2 %v529_v23 }
 0x1bb   :  { %v1291_v26 = vpop.eup %1290  ;;  %v360_v29 = vmul.f32 1.442695, %v354_v25 }
 0x1bc   :  { %v1855_v33 = vmul.f32 %v1291_v26, %v1852_v9 }
 0x1bd   :  { %1292 = vpow2.f32 %v360_v29  ;;  %v520_v35 = vpop.f32.mrf.mxu2 }
 0x1be   :  { %1171 = vmatmul.msk.f32.gmra.mxu1 %vm339_vm3, %v1855_v33  ;;  %v1860_v36 = vadd.f32 %v520_v35, %v1771_v15 }
 0x1c0   :  { %v351_v17 = vpop.xlane.xlu0 %350  ;;  %v532_v38 = vsel %vm339_vm3, %v1860_v36, -inf }
 0x1c1   :  { %v355_v42 = vsub.f32 %v1792_v27, %v351_v17  ;;  %533 = vmax.xlane.f32.xlu1 %v532_v38  ;;  %v1877_v27 = vld [vmem:[%s2058_s2 + $0x18] sm:$0xff] }
 0x1c3   :  { %v1293_v45 = vpop.eup %1292  ;;  %v362_v49 = vmul.f32 1.442695, %v355_v42 }
 0x1c4   :  { %v366_v51 = vmul.f32 %v1293_v45, %v1868_v44 }
 0x1c5   :  { %1294 = vpow2.f32 %v362_v49  ;;  %v716_v52 = vpop.f32.mrf.mxu0  ;;  %v523_v53 = vpop.f32.mrf.mxu2 }
 0x1c6   :  { %v717_v54 = vadd.f32 %v716_v52, %v1752_v0  ;;  %1172 = vmatmul.msk.f32.gmra.mxu1 %vm339_vm3, %v366_v51  ;;  %v374_v35 = vsel %vm339_vm3, %v366_v51, 0.0 }
 0x1c8   :  { %v728_v57 = vsel %vm339_vm3, %v717_v54, -inf }
 0x1c9   :  { %729 = vmax.xlane.f32.xlu0 %v728_v57 }
 0x1cb   :  { %v1295_v58 = vpop.eup %1294 }
 0x1cc   :  { %v367_v6 = vmul.f32 %v1295_v58, %v1877_v27 }
 0x1cd   :  { %v902_v8 = vpop.f32.mrf.mxu2 }
 0x1ce   :  { %1173 = vmatmul.msk.f32.gmra.mxu1 %vm339_vm3, %v367_v6  ;;  %v1883_v11 = vadd.f32 %v902_v8, %v1752_v0  ;;  %v719_v0 = vpop.f32.mrf.mxu0 }
 0x1cf   :  { %v1903_v21 = vadd.f32 %v719_v0, %v1762_v7 }
 0x1d0   :  { %v914_v16 = vsel %vm339_vm3, %v1883_v11, -inf }
 0x1d1   :  { %527 = vmax.xlane.f32.xlu0 %v526_v14  ;;  %1267 = vrot.lane.b32.xlu2 %v1266_v12, %s1489_s6  ;;  %v731_v23 = vsel %vm339_vm3, %v1903_v21, -inf  ;;  %v368_v14 = vsel %vm339_vm3, %v1839_v18, 0.0 }
 0x1d2   :  { %915 = vmax.xlane.f32.xlu1 %v914_v16 }
 0x1d5   :  { %v905_v60 = vpop.f32.mrf.mxu2 }
 0x1d6   :  { %v1890_v3 = vadd.f32 %v905_v60, %v1762_v7  ;;  %v722_v22 = vpop.f32.mrf.mxu0 }
 0x1d7   :  { %v1924_v29 = vadd.f32 %v722_v22, %v1771_v15 }
 0x1d8   :  { %v917_v4 = vsel %vm339_vm3, %v1890_v3, -inf }
 0x1d9   :  { %v734_v17 = vsel %vm339_vm3, %v1924_v29, -inf }
 0x1da   :  { %918 = vmax.xlane.f32.xlu1 %v917_v4 }
 0x1dd   :  { %v908_v10 = vpop.f32.mrf.mxu2 }
 0x1de   :  { %v725_v63 = vpop.f32.mrf.mxu0  ;;  %v1943_v19 = vadd.f32 %v908_v10, %v1771_v15 }
 0x1df   :  { %v1913_v39 = vadd.f32 %v725_v63, %v1785_v24 }
 0x1e0   :  { %v920_v62 = vsel %vm339_vm3, %v1943_v19, -inf }
 0x1e1   :  { %v737_v40 = vsel %vm339_vm3, %v1913_v39, -inf }
 0x1e5   :  { %1272 = vrot.lane.b32.xlu0 %v1271_v1, %s1489_s6  ;;  %v911_v25 = vpop.f32.mrf.mxu2  ;;  %v377_v1 = vsel %vm339_vm3, %v367_v6, 0.0 }
 0x1e6   :  { %v1908_v26 = vadd.f32 %v911_v25, %v1785_v24 }
 0x1e8   :  { %v923_v61 = vsel %vm339_vm3, %v1908_v26, -inf }
 0x1f3   :  { %1277 = vrot.lane.b32.xlu1 %v1276_v41, %s1490_s4  ;;  %v1918_v41 = vadd.f32 %v523_v53, %v1785_v24  ;;  %v371_v24 = vsel %vm339_vm3, %v1855_v33, 0.0 }
 0x1f5   :  { %v535_v7 = vsel %vm339_vm3, %v1918_v41, -inf }
 0x1fa   :  { %732 = vmax.xlane.f32.xlu2 %v731_v23 }
 0x202   :  { %924 = vmax.xlane.f32.xlu2 %v923_v61 }
 0x20a   :  { %738 = vmax.xlane.f32.xlu2 %v737_v40 }
 0x20f   :  { %536 = vmax.xlane.f32.xlu0 %v535_v7 }
 0x212   :  { %378 = vadd.xlane.f32.xlu2 %v377_v1 }
 0x21a   :  { %375 = vadd.xlane.f32.xlu2 %v374_v35 }
 0x21d   :  { %735 = vmax.xlane.f32.xlu1 %v734_v17 }
 0x223   :  { %1282 = vrot.lane.b32.xlu0 %v1281_v32, %s1490_s4 }
 0x225   :  { %372 = vadd.xlane.f32.xlu1 %v371_v24 }
 0x22c   :  { %v531_v38 = vpop.xlane.xlu2 %530 }
 0x22d   :  { %v539_v58 = vsub.f32 %v1844_v2, %v531_v38 }
 0x234   :  { %v1268_v42 = vpop.permute.xlu2 %1267 }
 0x235   :  { %v1270_v45 = vunpack.i.h.bf16 %v1268_v42  ;;  %v1269_v49 = vunpack.i.l.bf16 %v1268_v42 }
 0x237   :  { %v973_v51 = vsel %vm339_vm3, %v1240_v20, %v1269_v49  ;;  %v972_v52 = vsel %vm339_vm3, %v1245_v48, %v1270_v45  ;;  %v544_v48 = vmul.f32 1.442695, %v539_v58 }
 0x238   :  { %1002 = vmatpush.msrb.mxu3 %v973_v51 }
 0x23a   :  { %1003 = vmatpush.msrb.mxu3 %v972_v52 }
 0x23c   :  { %v730_v30 = vpop.xlane.xlu0 %729 }
 0x23d   :  { %v740_v31 = vsub.f32 %v717_v54, %v730_v30  ;;  %v534_v54 = vpop.xlane.xlu1 %533 }
 0x23e   :  { %v540_v2 = vsub.f32 %v1860_v36, %v534_v54 }
 0x23f   :  { %v744_v32 = vmul.f32 1.442695, %v740_v31 }
 0x240   :  { %v546_v8 = vmul.f32 1.442695, %v540_v2 }
 0x241   :  { %1296 = vpow2.f32 %v744_v32 }
 0x244   :  { %v528_v33 = vpop.xlane.xlu0 %527 }
 0x245   :  { %v538_v53 = vsub.f32 %v515_v5, %v528_v33  ;;  %v916_v12 = vpop.xlane.xlu1 %915 }
 0x246   :  { %v926_v38 = vsub.f32 %v1883_v11, %v916_v12 }
 0x247   :  { %v1297_v57 = vpop.eup %1296  ;;  %v542_v59 = vmul.f32 1.442695, %v538_v53  ;;  %v425_v53 = vpop.f32.mrf.mxu1 }
 0x248   :  { %v1946_v20 = vmul.f32 %v1297_v57, %v1835_v13  ;;  %v930_v45 = vmul.f32 1.442695, %v926_v38 }
 0x249   :  { %1298 = vpow2.f32 %v542_v59 }
 0x24a   :  { %v756_v46 = vsel %vm339_vm3, %v1946_v20, 0.0  ;;  %1300 = vpow2.f32 %v544_v48 }
 0x24b   :  { %757 = vadd.xlane.f32.xlu2 %v756_v46  ;;  %1302 = vpow2.f32 %v546_v8 }
 0x24d   :  { %921 = vmax.xlane.f32.xlu0 %v920_v62  ;;  %v919_v25 = vpop.xlane.xlu1 %918 }
 0x24e   :  { %v927_v49 = vsub.f32 %v1890_v3, %v919_v25 }
 0x24f   :  { %v1299_v5 = vpop.eup %1298  ;;  %v428_v2 = vpop.f32.mrf.mxu1 }
 0x250   :  { %v550_v15 = vmul.f32 %v1299_v5, %v1835_v13  ;;  %v1301_v16 = vpop.eup %1300  ;;  %v932_v52 = vmul.f32 1.442695, %v927_v49 }
 0x251   :  { %v551_v36 = vmul.f32 %v1301_v16, %v1852_v9  ;;  %v1303_v23 = vpop.eup %1302 }
 0x252   :  { %1182 = vmatmul.msk.f32.vlgmr.msra.gmra.mxu3 %vm339_vm3, %v550_v15  ;;  %v554_v6 = vsel %vm339_vm3, %v550_v15, 0.0  ;;  %v1968_v61 = vmul.f32 %v1303_v23, %v1868_v44 }
 0x253   :  { %555 = vadd.xlane.f32.xlu1 %v554_v6  ;;  %v557_v18 = vsel %vm339_vm3, %v551_v36, 0.0 }
 0x255   :  { %369 = vadd.xlane.f32.xlu0 %v368_v14 }
 0x257   :  { %v1273_v60 = vpop.permute.xlu0 %1272  ;;  %v2001_v16 = vpop.f32.mrf.mxu1 }
 0x258   :  { %v1275_v4 = vunpack.i.h.bf16 %v1273_v60  ;;  %v1274_v0 = vunpack.i.l.bf16 %v1273_v60 }
 0x25a   :  { %1183 = vmatmul.msk.f32.gmra.mxu3 %vm339_vm3, %v551_v36  ;;  %v971_v10 = vsel %vm339_vm3, %v1250_v50, %v1274_v0  ;;  %v970_v22 = vsel %vm339_vm3, %v1260_v56, %v1275_v4 }
 0x25b   :  { %1004 = vmatpush.msrb.mxu3 %v971_v10 }
 0x25d   :  { %1005 = vmatpush.msrb.mxu3 %v970_v22  ;;  %558 = vadd.xlane.f32.xlu0 %v557_v18 }
 0x25f   :  { %v434_v4 = vpop.f32.mrf.mxu1 }
 0x262   :  { %1184 = vmatmul.msk.f32.gmra.mxu3 %vm339_vm3, %v1968_v61 }
 0x265   :  { %v1278_v47 = vpop.permute.xlu1 %1277 }
 0x266   :  { %v1279_v63 = vunpack.i.l.bf16 %v1278_v47  ;;  %v1280_v50 = vunpack.i.h.bf16 %v1278_v47 }
 0x268   :  { %808 = vmatpush.msrb.mxu1 %v1279_v63 }
 0x26a   :  { %809 = vmatpush.msrb.mxu1 %v1280_v50 }
 0x26d   :  { %v733_v55 = vpop.xlane.xlu2 %732 }
 0x26e   :  { %v741_v56 = vsub.f32 %v1903_v21, %v733_v55 }
 0x270   :  { %v746_v40 = vmul.f32 1.442695, %v741_v56 }
 0x272   :  { %1304 = vpow2.f32 %v746_v40 }
 0x275   :  { %v925_v31 = vpop.xlane.xlu2 %924 }
 0x276   :  { %v929_v22 = vsub.f32 %v1908_v26, %v925_v31 }
 0x278   :  { %v1305_v7 = vpop.eup %1304  ;;  %v936_v23 = vmul.f32 1.442695, %v929_v22 }
 0x279   :  { %v753_v1 = vmul.f32 %v1305_v7, %v1852_v9 }
 0x27b   :  { %v759_v35 = vsel %vm339_vm3, %v753_v1, 0.0 }
 0x27c   :  { %760 = vadd.xlane.f32.xlu2 %v759_v35 }
 0x27d   :  { %v739_v54 = vpop.xlane.xlu2 %738 }
 0x27e   :  { %v743_v15 = vsub.f32 %v1913_v39, %v739_v54 }
 0x280   :  { %v750_v12 = vmul.f32 1.442695, %v743_v15 }
 0x282   :  { %v537_v17 = vpop.xlane.xlu0 %536 }
 0x283   :  { %v541_v24 = vsub.f32 %v1918_v41, %v537_v17 }
 0x285   :  { %v548_v42 = vmul.f32 1.442695, %v541_v24 }
 0x287   :  { %1306 = vpow2.f32 %v548_v42 }
 0x288   :  { %1308 = vpow2.f32 %v930_v45 }
 0x289   :  { %1310 = vpow2.f32 %v932_v52 }
 0x28d   :  { %v1307_v51 = vpop.eup %1306 }
 0x28e   :  { %v1979_v21 = vmul.f32 %v1307_v51, %v1877_v27  ;;  %v1309_v32 = vpop.eup %1308 }
 0x28f   :  { %v1985_v3 = vmul.f32 %v1309_v32, %v1835_v13  ;;  %v1311_v48 = vpop.eup %1310 }
 0x290   :  { %1185 = vmatmul.msk.f32.gmra.mxu3 %vm339_vm3, %v1979_v21  ;;  %v736_v30 = vpop.xlane.xlu1 %735  ;;  %v1994_v5 = vmul.f32 %v1311_v48, %v1852_v9  ;;  %v563_v49 = vsel %vm339_vm3, %v1979_v21, 0.0 }
 0x291   :  { %v742_v41 = vsub.f32 %v1924_v29, %v736_v30  ;;  %v942_v24 = vsel %vm339_vm3, %v1985_v3, 0.0 }
 0x292   :  { %v945_v52 = vsel %vm339_vm3, %v1994_v5, 0.0 }
 0x293   :  { %v748_v11 = vmul.f32 1.442695, %v742_v41 }
 0x295   :  { %1312 = vpow2.f32 %v748_v11  ;;  %v1283_v33 = vpop.permute.xlu0 %1282 }
 0x296   :  { %v1284_v57 = vunpack.i.l.bf16 %v1283_v33  ;;  %v1285_v58 = vunpack.i.h.bf16 %v1283_v33 }
 0x298   :  { %1206 = vmatmul.msk.f32.vlgmr.msrb.gmra.mxu3 %vm339_vm3, %v1985_v3  ;;  %v373_v59 = vpop.xlane.xlu1 %372  ;;  %810 = vmatpush.msrb.mxu1 %v1284_v57 }
 0x299   :  { %v381_v46 = vmax.f32 %v373_v59, 1e-30 }
 0x29a   :  { %811 = vmatpush.msrb.mxu1 %v1285_v58 }
 0x29b   :  { %v1313_v29 = vpop.eup %1312  ;;  %1314 = vrcp.f32 %v381_v46  ;;  %1194 = vmatmul.msk.f32.vlgmr.msrb.gmra.mxu1 %vm339_vm3, %v1946_v20  ;;  %v379_v20 = vpop.xlane.xlu2 %378 }
 0x29c   :  { %v754_v62 = vmul.f32 %v1313_v29, %v1868_v44  ;;  %1316 = vpow2.f32 %v750_v12  ;;  %v383_v14 = vmax.f32 %v379_v20, 1e-30 }
 0x29e   :  { %v762_v13 = vsel %vm339_vm3, %v754_v62, 0.0  ;;  %1318 = vrcp.f32 %v383_v14 }
 0x29f   :  { %763 = vadd.xlane.f32.xlu2 %v762_v13 }
 0x2a0   :  { %1207 = vmatmul.msk.f32.gmra.mxu3 %vm339_vm3, %v1994_v5 }
 0x2a1   :  { %v1315_v6 = vpop.eup %1314 }
 0x2a2   :  { %v442_v8 = vmul.f32 %v1315_v6, %v428_v2  ;;  %v1317_v9 = vpop.eup %1316 }
 0x2a3   :  { %1195 = vmatmul.msk.f32.gmra.mxu1 %vm339_vm3, %v753_v1  ;;  %v755_v39 = vmul.f32 %v1317_v9, %v1877_v27  ;;  %v376_v45 = vpop.xlane.xlu2 %375 }
 0x2a4   :  { %451 = vrot.lane.b32.xlu0 %v442_v8, %s1489_s6  ;;  %v1319_v60 = vpop.eup %1318  ;;  %v382_v3 = vmax.f32 %v376_v45, 1e-30 }
 0x2a5   :  { %v444_v0 = vmul.f32 %v1319_v60, %v434_v4  ;;  %v765_v40 = vsel %vm339_vm3, %v755_v39, 0.0 }
 0x2ab   :  { %1196 = vmatmul.msk.f32.gmra.mxu1 %vm339_vm3, %v754_v62 }
 0x2b3   :  { %1197 = vmatmul.msk.f32.gmra.mxu1 %vm339_vm3, %v755_v39 }
 0x2b7   :  { %455 = vrot.lane.b32.xlu2 %v444_v0, %s1489_s6 }
 0x2be   :  { %v758_v51 = vpop.xlane.xlu2 %757 }
 0x2bf   :  { %v768_v30 = vmax.f32 %v758_v51, 1e-30 }
 0x2c0   :  { %v922_v36 = vpop.xlane.xlu0 %921 }
 0x2c1   :  { %v928_v10 = vsub.f32 %v1943_v19, %v922_v36 }
 0x2c3   :  { %v934_v18 = vmul.f32 1.442695, %v928_v10 }
 0x2c5   :  { %1320 = vpow2.f32 %v934_v18 }
 0x2c6   :  { %v556_v25 = vpop.xlane.xlu1 %555  ;;  %1322 = vpow2.f32 %v936_v23 }
 0x2c7   :  { %v566_v55 = vmax.f32 %v556_v25, 1e-30 }
 0x2c8   :  { %v370_v47 = vpop.xlane.xlu0 %369 }
 0x2c9   :  { %v380_v63 = vmax.f32 %v370_v47, 1e-30 }
 0x2cb   :  { %v1321_v50 = vpop.eup %1320  ;;  %1324 = vrcp.f32 %v380_v63 }
 0x2cc   :  { %v940_v56 = vmul.f32 %v1321_v50, %v1868_v44  ;;  %1326 = vrcp.f32 %v566_v55  ;;  %v1323_v19 = vpop.eup %1322 }
 0x2cd   :  { %v941_v1 = vmul.f32 %v1323_v19, %v1877_v27  ;;  %v560_v27 = vsel %vm339_vm3, %v1968_v61, 0.0  ;;  %1328 = vrcp.f32 %v768_v30 }
 0x2ce   :  { %1208 = vmatmul.msk.f32.gmra.mxu3 %vm339_vm3, %v940_v56  ;;  %766 = vadd.xlane.f32.xlu0 %v765_v40  ;;  %v948_v44 = vsel %vm339_vm3, %v940_v56, 0.0 }
 0x2cf   :  { %v951_v42 = vsel %vm339_vm3, %v941_v1, 0.0 }
 0x2d0   :  { %v559_v32 = vpop.xlane.xlu0 %558 }
 0x2d1   :  { %v1325_v26 = vpop.eup %1324  ;;  %v567_v61 = vmax.f32 %v559_v32, 1e-30 }
 0x2d2   :  { %v441_v7 = vmul.f32 %v1325_v26, %v425_v53  ;;  %v1327_v35 = vpop.eup %1326 }
 0x2d3   :  { %v1329_v11 = vpop.eup %1328 }
 0x2d4   :  { %449 = vrot.lane.b32.xlu1 %v441_v7, %s1489_s6 }
 0x2d5   :  { %v627_v17 = vpop.f32.mrf.mxu3 }
 0x2d6   :  { %v643_v38 = vmul.f32 %v1327_v35, %v627_v17  ;;  %1209 = vmatmul.msk.f32.gmra.mxu3 %vm339_vm3, %v941_v1  ;;  %943 = vadd.xlane.f32.xlu0 %v942_v24 }
 0x2d8   :  { %651 = vrot.lane.b32.xlu2 %v643_v38, %s1489_s6 }
 0x2dd   :  { %v630_v59 = vpop.f32.mrf.mxu3 }
 0x2de   :  { %949 = vadd.xlane.f32.xlu0 %v948_v44 }
 0x2e5   :  { %v633_v6 = vpop.f32.mrf.mxu3 }
 0x2e6   :  { %952 = vadd.xlane.f32.xlu0 %v951_v42 }
 0x2ef   :  { %v761_v31 = vpop.xlane.xlu2 %760 }
 0x2f0   :  { %v769_v41 = vmax.f32 %v761_v31, 1e-30 }
 0x2f2   :  { %1330 = vrcp.f32 %v769_v41 }
 0x2f3   :  { %1332 = vrcp.f32 %v567_v61 }
 0x2f4   :  { %1334 = vrcp.f32 %v382_v3 }
 0x2f8   :  { %v1331_v21 = vpop.eup %1330 }
 0x2f9   :  { %v1333_v48 = vpop.eup %1332 }
 0x2fa   :  { %v644_v29 = vmul.f32 %v1333_v48, %v630_v59  ;;  %v1335_v54 = vpop.eup %1334  ;;  %v1058_v59 = vld [vmem:[#allocation8 + $0x38] sm:$0xff]  ;;  %v1055_v48 = vld [vmem:[#allocation8 + $0x20] sm:$0xff] }
 0x2fb   :  { %v443_v13 = vmul.f32 %v1335_v54, %v2001_v16  ;;  %1092 = vmatpush.msrb.mxu0 %v1058_v59  ;;  %1216 = vmatpush.msrb.mxu2 %v1058_v59  ;;  %v1054_v54 = vld [vmem:[#allocation8 + $0x18] sm:$0xff] }
 0x2fe   :  { %561 = vadd.xlane.f32.xlu1 %v560_v27 }
 0x306   :  { %564 = vadd.xlane.f32.xlu1 %v563_v49 }
 0x30e   :  { %946 = vadd.xlane.f32.xlu1 %v945_v52 }
 0x312   :  { %v764_v46 = vpop.xlane.xlu2 %763 }
 0x313   :  { %v770_v62 = vmax.f32 %v764_v46, 1e-30  ;;  %v636_v12 = vpop.f32.mrf.mxu3  ;;  %v1057_v46 = vld [vmem:[#allocation8 + $0x30] sm:$0xff] }
 0x314   :  { %1093 = vmatpush.msrb.mxu0 %v1057_v46  ;;  %1217 = vmatpush.msrb.mxu2 %v1057_v46 }
 0x315   :  { %1336 = vrcp.f32 %v770_v62 }
 0x316   :  { %v452_v8 = vpop.permute.xlu0 %451 }
 0x317   :  { %v462_v52 = vadd.f32 %v452_v8, %v1670_v34  ;;  %v1056_v34 = vld [vmem:[#allocation8 + $0x28] sm:$0xff] }
 0x318   :  { %v813_v33 = vpop.f32.mrf.mxu1  ;;  %1094 = vmatpush.msrb.mxu0 %v1056_v34  ;;  %1218 = vmatpush.msrb.mxu2 %v1056_v34 }
 0x319   :  { %v829_v53 = vmul.f32 %v1329_v11, %v813_v33 }
 0x31a   :  { %v456_v41 = vpop.permute.xlu2 %455  ;;  %1095 = vmatpush.msrb.mxu0 %v1055_v48  ;;  %1219 = vmatpush.msrb.mxu2 %v1055_v48 }
 0x31b   :  { %837 = vrot.lane.b32.xlu0 %v829_v53, %s1489_s6  ;;  %v1337_v2 = vpop.eup %1336  ;;  %v1007_v9 = vpop.f32.mrf.mxu3 }
 0x31c   :  { %1096 = vmatpush.msrb.mxu0 %v1054_v54  ;;  %1220 = vmatpush.msrb.mxu2 %v1054_v54 }
 0x320   :  { %v816_v57 = vpop.f32.mrf.mxu1 }
 0x321   :  { %v830_v58 = vmul.f32 %v1331_v21, %v816_v57 }
 0x323   :  { %839 = vrot.lane.b32.xlu2 %v830_v58, %s1489_s6  ;;  %v1010_v36 = vpop.f32.mrf.mxu3 }
 0x327   :  { %653 = vrot.lane.b32.xlu1 %v644_v29, %s1489_s6 }
 0x328   :  { %v819_v5 = vpop.f32.mrf.mxu1 }
 0x329   :  { %v831_v15 = vmul.f32 %v1337_v2, %v819_v5  ;;  %v1053_v5 = vld [vmem:[#allocation8 + $0x10] sm:$0xff] }
 0x32a   :  { %1097 = vmatpush.msrb.mxu0 %v1053_v5  ;;  %1221 = vmatpush.msrb.mxu2 %v1053_v5 }
 0x32b   :  { %453 = vrot.lane.b32.xlu2 %v443_v13, %s1489_s6 }
 0x330   :  { %v822_v4 = vpop.f32.mrf.mxu1 }
 0x332   :  { %v652_v33 = vpop.permute.xlu2 %651 }
 0x333   :  { %841 = vrot.lane.b32.xlu2 %v831_v15, %s1489_s6  ;;  %v1052_v15 = vld [vmem:[#allocation8 + $0x8] sm:$0xff] }
 0x334   :  { %1098 = vmatpush.msrb.mxu0 %v1052_v15  ;;  %1222 = vmatpush.msrb.mxu2 %v1052_v15 }
 0x341   :  { %v767_v20 = vpop.xlane.xlu0 %766 }
 0x342   :  { %v771_v14 = vmax.f32 %v767_v20, 1e-30 }
 0x344   :  { %1338 = vrcp.f32 %v771_v14 }
 0x346   :  { %v450_v19 = vpop.permute.xlu1 %449 }
 0x347   :  { %v461_v11 = vadd.f32 %v450_v19, %v1652_v28  ;;  %v464_v28 = vadd.f32 %v456_v41, %v1692_v43 }
 0x349   :  { %v944_v39 = vpop.xlane.xlu0 %943  ;;  %v663_v61 = vadd.f32 %v652_v33, %v461_v11 }
 0x34a   :  { %v1339_v60 = vpop.eup %1338  ;;  %v954_v0 = vmax.f32 %v944_v39, 1e-30 }
 0x34b   :  { %v832_v16 = vmul.f32 %v1339_v60, %v822_v4 }
 0x34c   :  { %1340 = vrcp.f32 %v954_v0 }
 0x34d   :  { %843 = vrot.lane.b32.xlu1 %v832_v16, %s1489_s6 }
 0x351   :  { %v950_v10 = vpop.xlane.xlu0 %949  ;;  %v1013_v23 = vpop.f32.mrf.mxu3 }
 0x352   :  { %v1341_v22 = vpop.eup %1340  ;;  %v956_v63 = vmax.f32 %v950_v10, 1e-30 }
 0x353   :  { %v1023_v18 = vmul.f32 %v1341_v22, %v1007_v9 }
 0x355   :  { %1031 = vrot.lane.b32.xlu1 %v1023_v18, %s1489_s6 }
 0x359   :  { %v953_v25 = vpop.xlane.xlu0 %952  ;;  %v1016_v55 = vpop.f32.mrf.mxu3 }
 0x35a   :  { %v957_v47 = vmax.f32 %v953_v25, 1e-30 }
 0x35c   :  { %1342 = vrcp.f32 %v957_v47 }
 0x35d   :  { %1344 = vrcp.f32 %v956_v63 }
 0x362   :  { %v1343_v50 = vpop.eup %1342 }
 0x363   :  { %v1026_v56 = vmul.f32 %v1343_v50, %v1016_v55  ;;  %v1345_v40 = vpop.eup %1344 }
 0x364   :  { %v1025_v26 = vmul.f32 %v1345_v40, %v1013_v23 }
 0x365   :  { %1037 = vrot.lane.b32.xlu1 %v1026_v56, %s1489_s6 }
 0x36d   :  { %1035 = vrot.lane.b32.xlu1 %v1025_v26, %s1489_s6 }
 0x371   :  { %v562_v7 = vpop.xlane.xlu1 %561 }
 0x372   :  { %v568_v42 = vmax.f32 %v562_v7, 1e-30 }
 0x379   :  { %v565_v1 = vpop.xlane.xlu1 %564 }
 0x37a   :  { %v569_v35 = vmax.f32 %v565_v1, 1e-30 }
 0x37c   :  { %1346 = vrcp.f32 %v569_v35 }
 0x37d   :  { %v840_v29 = vpop.permute.xlu2 %839 }
 0x381   :  { %v947_v17 = vpop.xlane.xlu1 %946 }
 0x382   :  { %v1347_v24 = vpop.eup %1346  ;;  %v955_v38 = vmax.f32 %v947_v17, 1e-30 }
 0x383   :  { %v646_v44 = vmul.f32 %v1347_v24, %v636_v12  ;;  %v1051_v12 = vld [vmem:[#allocation8] sm:$0xff] }
 0x384   :  { %1348 = vrcp.f32 %v955_v38  ;;  %1099 = vmatpush.msrb.mxu0 %v1051_v12  ;;  %1223 = vmatpush.msrb.mxu2 %v1051_v12 }
 0x385   :  { %657 = vrot.lane.b32.xlu0 %v646_v44, %s1489_s6  ;;  %1350 = vrcp.f32 %v568_v42  ;;  %v454_v43 = vpop.permute.xlu2 %453 }
 0x386   :  { %v463_v4 = vadd.f32 %v454_v43, %v1678_v37  ;;  %v1287_v37 = vld [vmem:[%s2065_s9] ss:$0 sm:$0xff] }
 0x38a   :  { %v1349_v27 = vpop.eup %1348 }
 0x38b   :  { %v1024_v45 = vmul.f32 %v1349_v27, %v1010_v36  ;;  %v1351_v49 = vpop.eup %1350 }
 0x38c   :  { %v645_v51 = vmul.f32 %v1351_v49, %v633_v6 }
 0x38d   :  { %1033 = vrot.lane.b32.xlu0 %v1024_v45, %s1489_s6  ;;  %v838_v53 = vpop.permute.xlu0 %837  ;;  %v842_v36 = vpop.permute.xlu2 %841 }
 0x38e   :  { %v849_v3 = vadd.f32 %v838_v53, %v663_v61 }
 0x395   :  { %655 = vrot.lane.b32.xlu0 %v645_v51, %s1489_s6 }
 0x399   :  { %v654_v30 = vpop.permute.xlu1 %653 }
 0x39a   :  { %v664_v31 = vadd.f32 %v654_v30, %v462_v52 }
 0x39c   :  { %v850_v20 = vadd.f32 %v840_v29, %v664_v31 }
 0x3bf   :  { %v844_v32 = vpop.permute.xlu1 %843 }
 0x3c7   :  { %v1032_v21 = vpop.permute.xlu1 %1031 }
 0x3c8   :  { %v1043_v57 = vadd.f32 %v1032_v21, %v849_v3 }
 0x3ca   :  { %v1047_v58 = vmax.f32 %v1043_v57, 0.0 }
 0x3cc   :  { %1067 = vrot.lane.b32.xlu0 %v1047_v58, %s1490_s4 }
 0x3d7   :  { %v1038_v6 = vpop.permute.xlu1 %1037 }
 0x3df   :  { %v1036_v22 = vpop.permute.xlu1 %1035 }
 0x3f7   :  { %v658_v62 = vpop.permute.xlu0 %657 }
 0x3f8   :  { %v666_v13 = vadd.f32 %v658_v62, %v464_v28 }
 0x3fa   :  { %v852_v2 = vadd.f32 %v844_v32, %v666_v13 }
 0x3fc   :  { %v1046_v8 = vadd.f32 %v1038_v6, %v852_v2 }
 0x3fe   :  { %v1050_v14 = vmax.f32 %v1046_v8, 0.0 }
 0x3ff   :  { %v1034_v9 = vpop.permute.xlu0 %1033 }
 0x400   :  { %v1044_v39 = vadd.f32 %v1034_v9, %v850_v20  ;;  %1073 = vrot.lane.b32.xlu1 %v1050_v14, %s1490_s4 }
 0x402   :  { %v1048_v60 = vmax.f32 %v1044_v39, 0.0 }
 0x404   :  { %1069 = vrot.lane.b32.xlu2 %v1048_v60, %s1490_s4 }
 0x407   :  { %v656_v0 = vpop.permute.xlu0 %655 }
 0x408   :  { %v665_v16 = vadd.f32 %v656_v0, %v463_v4 }
 0x40a   :  { %v851_v10 = vadd.f32 %v842_v36, %v665_v16 }
 0x40c   :  { %v1045_v18 = vadd.f32 %v1036_v22, %v851_v10 }
 0x40e   :  { %v1049_v23 = vmax.f32 %v1045_v18, 0.0 }
 0x410   :  { %1071 = vrot.lane.b32.xlu0 %v1049_v23, %s1490_s4 }
 0x43e   :  { %v1068_v25 = vpop.permute.xlu0 %1067 }
 0x43f   :  { %1210 = vmatmul.msk.f32.vlgmr.msrb.gmra.mxu0 %vm1075_vm4, %v1068_v25 }
 0x45e   :  { %v1070_v47 = vpop.permute.xlu2 %1069 }
 0x45f   :  { %1211 = vmatmul.msk.f32.gmra.mxu0 %vm1075_vm4, %v1070_v47 }
 0x472   :  { %v1074_v63 = vpop.permute.xlu1 %1073 }
 0x473   :  { %1213 = vmatmul.msk.f32.vlgmr.msrb.gmra.mxu2 %vm1075_vm4, %v1074_v63 }
 0x482   :  { %v1072_v50 = vpop.permute.xlu0 %1071 }
 0x483   :  { %1212 = vmatmul.msk.f32.gmra.mxu0 %vm1075_vm4, %v1072_v50 }
 0x4bc   :  { %v1101_v55 = vpop.f32.mrf.mxu0 }
 0x4bd   :  { %v1102_v56 = vadd.f32 %v1287_v37, %v1101_v55 }
 0x4bf   :  { %v1113_v40 = vmax.f32 %v1102_v56, 0.0 }
 0x4c1   :  { %1117 = vst [vmem:[#allocation10] sm:$0xff] %v1113_v40 }
 0x4dc   :  { %v1104_v19 = vpop.f32.mrf.mxu0 }
 0x4dd   :  { %v1105_v26 = vadd.f32 %v1287_v37, %v1104_v19 }
 0x4df   :  { %v1114_v7 = vmax.f32 %v1105_v26, 0.0 }
 0x4e1   :  { %1118 = vst [vmem:[#allocation10 + $0x8] sm:$0xff] %v1114_v7 }
 0x4f6   :  { %v1110_v1 = vpop.f32.mrf.mxu2 }
 0x4f7   :  { %v1111_v35 = vadd.f32 %v1287_v37, %v1110_v1 }
 0x4f9   :  { %v1116_v17 = vmax.f32 %v1111_v35, 0.0 }
 0x4fb   :  { %1120 = vst [vmem:[#allocation10 + $0x18] sm:$0xff] %v1116_v17 }
 0x500   :  { %v1107_v24 = vpop.f32.mrf.mxu0 }
 0x501   :  { %v1108_v38 = vadd.f32 %v1287_v37, %v1107_v24 }
 0x503   :  { %v1115_v44 = vmax.f32 %v1108_v38, 0.0 }
 0x505   :  { %1119 = vst [vmem:[#allocation10 + $0x10] sm:$0xff] %v1115_v44 }
 0x506   :  { %1133 = dma.vmem_to_hbm [thread:$0]  %s1126_s22, 512, %s1128_s0, [#allocation4], %s1482_s23, %s1482_s23, %s1483_s24  }
 0x507   :  { %1478 = dma.done.wait [#allocation4], 512  }
 0x508   :  { %1479 = vsyncadd [#allocation4], 4294966784 }
 0x509   :  { %1138 = vsyncpa [#allocation3], 1 }
 0x50a   :  { %1139 = vsyncpa [#allocation6], 1 }
 0x50b   :  { %1140 = vsyncpa [#allocation9], 1 }
 0x50c   :  { %1141 = vsyncpa [#allocation4], 1 }

</bundles_post_ra>
